<compile_context>
chip_gen: v6e
topology: v6e:2x2x1
jax: 0.10.0
libtpu: 0.0.40
codegen_flags: <defaults>
</compile_context>

<pallas_src>
import math
import functools

import jax
import jax.numpy as jnp
from jax.experimental import pallas as pl
from jax.experimental.pallas import tpu as pltpu


_SQRT1_2 = 0.7071067811865476  # 1/sqrt(2)


def _erf_approx(z):
    # Abramowitz & Stegun 7.1.26 rational approximation; |error| < 1.5e-7.
    # Uses only exp / mul / add / divide, all of which lower cleanly in Mosaic.
    # TODO(synk): switch to lax.erf directly if/when Mosaic lowers erf_p natively.
    a1, a2, a3, a4, a5 = (0.254829592, -0.284496736, 1.421413741,
                          -1.453152027, 1.061405429)
    p = 0.3275911
    az = jnp.abs(z)
    t = 1.0 / (1.0 + p * az)
    poly = ((((a5 * t + a4) * t + a3) * t + a2) * t + a1) * t
    y = 1.0 - poly * jnp.exp(-az * az)
    return jnp.where(z < 0.0, -y, y)


def _gelu_exact(h):
    # Matches PyTorch nn.GELU() default (erf form, NOT the tanh approximation).
    return 0.5 * h * (1.0 + _erf_approx(h * _SQRT1_2))


def ffn_kernel(x_ref, w1_ref, b1_ref, w2_ref, b2_ref, out_ref):
    # x_ref: (tile_m, dim_p)     w1_ref: (dim_p, hid_p)   b1_ref: (1, hid_p)
    # w2_ref: (hid_p, dim_p)     b2_ref: (1, dim_p)       out_ref: (tile_m, dim_p)
    x = x_ref[...]

    # First projection + exact GELU, all in f32 on the MXU/VPU/EUP.
    h = jnp.dot(x, w1_ref[...], preferred_element_type=jnp.float32) + b1_ref[...]
    h = _gelu_exact(h)

    # Second projection back to model dim. Output block is lane-dense (dim padded
    # to a multiple of 128), so this is a plain unmasked store.
    y = jnp.dot(h, w2_ref[...], preferred_element_type=jnp.float32) + b2_ref[...]
    out_ref[...] = y.astype(out_ref.dtype)


def _round_up(x, m):
    return (x + m - 1) // m * m


def feedforward_forward(x, w1, b1, w2, b2, *, tile_m=None):
    """y = GELU(x @ w1 + b1) @ w2 + b2, x: (B, N, dim).

    Weights are stored as (in_features, out_features) — the transpose of
    PyTorch nn.Linear.weight. Biases are (1, out_features).
    """
    B, N, dim = x.shape
    hidden = w1.shape[1]
    assert w1.shape == (dim, hidden)
    assert b1.shape == (1, hidden)
    assert w2.shape == (hidden, dim)
    assert b2.shape == (1, dim)

    LANE, SUBLANE = 128, 8
    dim_p = _round_up(dim, LANE)
    hid_p = _round_up(hidden, LANE)

    M = B * N
    if tile_m is None:
        # Big tiles for real workloads; for tiny M keep >=2 grid steps so both
        # v7x TensorCores get work (free on v5e/v6e which have a single TC).
        tile_m = 128 if M >= 256 else SUBLANE
    M_p = _round_up(M, tile_m)
    grid_m = M_p // tile_m

    # Zero-pad rows to a tile multiple and feature dims to 128 lanes (exact math;
    # padded rows/cols are dropped below).
    x2 = jnp.pad(x.reshape(M, dim), ((0, M_p - M), (0, dim_p - dim)))
    w1p = jnp.pad(w1, ((0, dim_p - dim), (0, hid_p - hidden)))
    b1p = jnp.pad(b1, ((0, 0), (0, hid_p - hidden)))
    w2p = jnp.pad(w2, ((0, hid_p - hidden), (0, dim_p - dim)))
    b2p = jnp.pad(b2, ((0, 0), (0, dim_p - dim)))

    out_p = pl.pallas_call(
        ffn_kernel,
        out_shape=jax.ShapeDtypeStruct((M_p, dim_p), x.dtype),
        grid_spec=pltpu.PrefetchScalarGridSpec(
            num_scalar_prefetch=0,
            grid=(grid_m,),
            in_specs=[
                pl.BlockSpec((tile_m, dim_p), lambda i: (i, 0)),   # x row-tile
                pl.BlockSpec((dim_p, hid_p), lambda i: (0, 0)),    # W1 (resident)
                pl.BlockSpec((1, hid_p), lambda i: (0, 0)),        # b1
                pl.BlockSpec((hid_p, dim_p), lambda i: (0, 0)),    # W2 (resident)
                pl.BlockSpec((1, dim_p), lambda i: (0, 0)),        # b2
            ],
            out_specs=pl.BlockSpec((tile_m, dim_p), lambda i: (i, 0)),
        ),
        compiler_params=pltpu.CompilerParams(
            dimension_semantics=("parallel",)),
    )(x2, w1p, b1p, w2p, b2p)

    return out_p[:M, :dim].reshape(B, N, dim)


def feedforward_reference(x, w1, b1, w2, b2):
    """Pure-JAX reference mirroring PyTorch FeedForward.forward (eval mode)."""
    h = x @ w1 + b1[0]
    h = jax.nn.gelu(h, approximate=False)   # nn.GELU() default: exact erf GELU
    return h @ w2 + b2[0]


if __name__ == "__main__":
    # Small shapes consistent with the module: x (B, N, dim), hidden_dim = FFN width.
    B, N, dim, hidden_dim = 2, 8, 32, 128

    key = jax.random.PRNGKey(0)
    ks = jax.random.split(key, 5)

    x = jax.random.normal(ks[0], (B, N, dim), dtype=jnp.float32)

    def init_linear(kw, kb, fan_in, fan_out):
        bound = 1.0 / math.sqrt(fan_in)
        w = jax.random.uniform(kw, (fan_in, fan_out), jnp.float32, -bound, bound)
        b = jax.random.uniform(kb, (1, fan_out), jnp.float32, -bound, bound)
        return w, b

    w1, b1 = init_linear(ks[1], ks[2], dim, hidden_dim)
    w2, b2 = init_linear(ks[3], ks[4], hidden_dim, dim)

    out = feedforward_forward(x, w1, b1, w2, b2)
    out = jax.block_until_ready(out)

    ref = feedforward_reference(x, w1, b1, w2, b2)
    assert out.shape == (B, N, dim)
    max_err = jnp.max(jnp.abs(out - ref))
    assert jnp.allclose(out, ref, atol=1e-4, rtol=1e-4), f"max abs err {max_err}"

    print("KERNEL_OK")
</pallas_src>

<mosaic_0001>
module attributes {stable_mosaic.version = 11 : i64} {
  func.func @ffn_kernel(%arg0: i32, %arg1: memref<8x128xf32, #tpu.memory_space<vmem>>, %arg2: memref<128x128xf32, #tpu.memory_space<vmem>>, %arg3: memref<1x128xf32, #tpu.memory_space<vmem>>, %arg4: memref<128x128xf32, #tpu.memory_space<vmem>>, %arg5: memref<1x128xf32, #tpu.memory_space<vmem>>, %arg6: memref<8x128xf32, #tpu.memory_space<vmem>>) attributes {dimension_semantics = [#tpu.dimension_semantics<parallel>], iteration_bounds = array<i64: 2>, scalar_prefetch = 0 : i64, scratch_operands = 0 : i64, tpu.core_type = #tpu.core_type<tc>, window_params = [{transform_indices = @transform_0, window_bounds = array<i64: 8, 128>}, {pipeline_mode = #tpu.pipeline_mode<synchronous>, transform_indices = @transform_1, window_bounds = array<i64: 128, 128>}, {pipeline_mode = #tpu.pipeline_mode<synchronous>, transform_indices = @transform_2, window_bounds = array<i64: 1, 128>}, {pipeline_mode = #tpu.pipeline_mode<synchronous>, transform_indices = @transform_3, window_bounds = array<i64: 128, 128>}, {pipeline_mode = #tpu.pipeline_mode<synchronous>, transform_indices = @transform_4, window_bounds = array<i64: 1, 128>}, {transform_indices = @transform_5, window_bounds = array<i64: 8, 128>}]} {
    %c0 = arith.constant 0 : index
    %c0_0 = arith.constant 0 : index
    %0 = vector.load %arg1[%c0, %c0_0] : memref<8x128xf32, #tpu.memory_space<vmem>>, vector<8x128xf32>
    %c0_1 = arith.constant 0 : index
    %c0_2 = arith.constant 0 : index
    %1 = vector.load %arg2[%c0_1, %c0_2] : memref<128x128xf32, #tpu.memory_space<vmem>>, vector<128x128xf32>
    %cst = arith.constant dense<0.000000e+00> : vector<8x128xf32>
    %2 = tpu.matmul %0, %1, %cst {dimension_numbers = #tpu.dot_dimension_numbers<[1], [0], [0], [1], [0, 0, 1, 1], [], []>} : vector<8x128xf32>, vector<128x128xf32>, vector<8x128xf32> -> vector<8x128xf32>
    %c0_3 = arith.constant 0 : index
    %c0_4 = arith.constant 0 : index
    %3 = vector.load %arg3[%c0_3, %c0_4] : memref<1x128xf32, #tpu.memory_space<vmem>>, vector<1x128xf32>
    %4 = vector.broadcast %3 : vector<1x128xf32> to vector<8x128xf32>
    %5 = arith.addf %2, %4 : vector<8x128xf32>
    %cst_5 = arith.constant 5.000000e-01 : f32
    %6 = vector.broadcast %cst_5 : f32 to vector<8x128xf32>
    %7 = arith.mulf %6, %5 : vector<8x128xf32>
    %cst_6 = arith.constant 0.707106769 : f32
    %8 = vector.broadcast %cst_6 : f32 to vector<8x128xf32>
    %9 = arith.mulf %5, %8 : vector<8x128xf32>
    %10 = math.absf %9 : vector<8x128xf32>
    %cst_7 = arith.constant 0.327591091 : f32
    %11 = vector.broadcast %cst_7 : f32 to vector<8x128xf32>
    %12 = arith.mulf %11, %10 : vector<8x128xf32>
    %cst_8 = arith.constant 1.000000e+00 : f32
    %13 = vector.broadcast %cst_8 : f32 to vector<8x128xf32>
    %14 = arith.addf %13, %12 : vector<8x128xf32>
    %cst_9 = arith.constant 1.000000e+00 : f32
    %15 = vector.broadcast %cst_9 : f32 to vector<8x128xf32>
    %16 = arith.divf %15, %14 : vector<8x128xf32>
    %cst_10 = arith.constant 1.06140542 : f32
    %17 = vector.broadcast %cst_10 : f32 to vector<8x128xf32>
    %18 = arith.mulf %17, %16 : vector<8x128xf32>
    %cst_11 = arith.constant -1.45315206 : f32
    %19 = vector.broadcast %cst_11 : f32 to vector<8x128xf32>
    %20 = arith.addf %18, %19 : vector<8x128xf32>
    %21 = arith.mulf %20, %16 : vector<8x128xf32>
    %cst_12 = arith.constant 1.42141378 : f32
    %22 = vector.broadcast %cst_12 : f32 to vector<8x128xf32>
    %23 = arith.addf %21, %22 : vector<8x128xf32>
    %24 = arith.mulf %23, %16 : vector<8x128xf32>
    %cst_13 = arith.constant -0.284496725 : f32
    %25 = vector.broadcast %cst_13 : f32 to vector<8x128xf32>
    %26 = arith.addf %24, %25 : vector<8x128xf32>
    %27 = arith.mulf %26, %16 : vector<8x128xf32>
    %cst_14 = arith.constant 0.254829586 : f32
    %28 = vector.broadcast %cst_14 : f32 to vector<8x128xf32>
    %29 = arith.addf %27, %28 : vector<8x128xf32>
    %30 = arith.mulf %29, %16 : vector<8x128xf32>
    %cst_15 = arith.constant 0.000000e+00 : f32
    %31 = vector.broadcast %cst_15 : f32 to vector<8x128xf32>
    %32 = arith.subf %31, %10 : vector<8x128xf32>
    %33 = arith.mulf %32, %10 : vector<8x128xf32>
    %34 = math.exp %33 : vector<8x128xf32>
    %35 = arith.mulf %30, %34 : vector<8x128xf32>
    %cst_16 = arith.constant 1.000000e+00 : f32
    %36 = vector.broadcast %cst_16 : f32 to vector<8x128xf32>
    %37 = arith.subf %36, %35 : vector<8x128xf32>
    %cst_17 = arith.constant 0.000000e+00 : f32
    %38 = vector.broadcast %cst_17 : f32 to vector<8x128xf32>
    %39 = arith.cmpf olt, %9, %38 : vector<8x128xf32>
    %cst_18 = arith.constant 0.000000e+00 : f32
    %40 = vector.broadcast %cst_18 : f32 to vector<8x128xf32>
    %41 = arith.subf %40, %37 : vector<8x128xf32>
    %42 = arith.select %39, %41, %37 : vector<8x128xi1>, vector<8x128xf32>
    %cst_19 = arith.constant 1.000000e+00 : f32
    %43 = vector.broadcast %cst_19 : f32 to vector<8x128xf32>
    %44 = arith.addf %43, %42 : vector<8x128xf32>
    %45 = arith.mulf %7, %44 : vector<8x128xf32>
    %c0_20 = arith.constant 0 : index
    %c0_21 = arith.constant 0 : index
    %46 = vector.load %arg4[%c0_20, %c0_21] : memref<128x128xf32, #tpu.memory_space<vmem>>, vector<128x128xf32>
    %cst_22 = arith.constant dense<0.000000e+00> : vector<8x128xf32>
    %47 = tpu.matmul %45, %46, %cst_22 {dimension_numbers = #tpu.dot_dimension_numbers<[1], [0], [0], [1], [0, 0, 1, 1], [], []>} : vector<8x128xf32>, vector<128x128xf32>, vector<8x128xf32> -> vector<8x128xf32>
    %c0_23 = arith.constant 0 : index
    %c0_24 = arith.constant 0 : index
    %48 = vector.load %arg5[%c0_23, %c0_24] : memref<1x128xf32, #tpu.memory_space<vmem>>, vector<1x128xf32>
    %49 = vector.broadcast %48 : vector<1x128xf32> to vector<8x128xf32>
    %50 = arith.addf %47, %49 : vector<8x128xf32>
    %c0_25 = arith.constant 0 : index
    %c0_26 = arith.constant 0 : index
    %51 = vector.load %arg6[%c0_25, %c0_26] : memref<8x128xf32, #tpu.memory_space<vmem>>, vector<8x128xf32>
    tpu.vector_store %arg6[%c0_25, %c0_26], %50 {strides = array<i32>} : memref<8x128xf32, #tpu.memory_space<vmem>>, vector<8x128xf32>,
    return
  }
  func.func @transform_0(%arg0: i32) -> (i32, i32) {
    %c0_i32 = arith.constant 0 : i32
    %c0_i32_0 = arith.constant 0 : i32
    return %arg0, %c0_i32 : i32, i32
  }
  func.func @transform_1(%arg0: i32) -> (i32, i32) {
    %c0_i32 = arith.constant 0 : i32
    %c0_i32_0 = arith.constant 0 : i32
    %c0_i32_1 = arith.constant 0 : i32
    return %c0_i32, %c0_i32_0 : i32, i32
  }
  func.func @transform_2(%arg0: i32) -> (i32, i32) {
    %c0_i32 = arith.constant 0 : i32
    %c0_i32_0 = arith.constant 0 : i32
    %c0_i32_1 = arith.constant 0 : i32
    return %c0_i32, %c0_i32_0 : i32, i32
  }
  func.func @transform_3(%arg0: i32) -> (i32, i32) {
    %c0_i32 = arith.constant 0 : i32
    %c0_i32_0 = arith.constant 0 : i32
    %c0_i32_1 = arith.constant 0 : i32
    return %c0_i32, %c0_i32_0 : i32, i32
  }
  func.func @transform_4(%arg0: i32) -> (i32, i32) {
    %c0_i32 = arith.constant 0 : i32
    %c0_i32_0 = arith.constant 0 : i32
    %c0_i32_1 = arith.constant 0 : i32
    return %c0_i32, %c0_i32_0 : i32, i32
  }
  func.func @transform_5(%arg0: i32) -> (i32, i32) {
    %c0_i32 = arith.constant 0 : i32
    %c0_i32_0 = arith.constant 0 : i32
    return %arg0, %c0_i32 : i32, i32
  }
}

</mosaic_0001>

<bundles_post_ra>
// kernel: tpu_custom_call.1
= control target key start
LH: loop header
LB: loop body
LE: loop exit
PB: predicated region body
PF: predicated region fallthrough
CT: control target
= control target key end

     0   :  { %10 = vsyncpa [#allocation3], 0  ;;  %s1190_s0 = inlined_call_operand.hbm [shape: f32[16,128], index: 0, kind: input, shape index: {}]   ;;  %s1191_s1 = inlined_call_operand.hbm [shape: f32[128,128], index: 1, kind: input, shape index: {}]   ;;  %s1192_s2 = inlined_call_operand.vmem [shape: f32[1,128], index: 2, kind: input, shape index: {}]   ;;  %s1193_s3 = inlined_call_operand.hbm [shape: f32[128,128], index: 3, kind: input, shape index: {}]   ;;  %s1194_s4 = inlined_call_operand.vmem [shape: f32[1,128], index: 4, kind: input, shape index: {}]   ;;  %s1195_s5 = inlined_call_operand.hbm [shape: f32[16,128], index: 5, kind: output, shape index: {}]  }
   0x1   :  { %12 = vsyncpa [#allocation3 + $0x1], 0 }
   0x2   :  { %13 = vsyncpa [#allocation6], 0 }
   0x3   :  { %14 = vsyncpa [#allocation4], 0 }
   0x4   :  { %16 = vsyncpa [#allocation4 + $0x1], 0  ;;  %s972_s18 = smov 0   ;;  %s974_s19 = smov 0  }
   0x5   :  { %s976_s20 = smov 0   ;;  %s978_s21 = smov 0  }
   0x6 LB: > { %s993_s22 = sadd.s32 4294967295, %s932_s21   ;;  %s587_s23 = sadd.s32 4294967294, %s932_s21   ;;  %s932_s21 = sphi %s978_s21, %s1217_s21   ;;  %s928_s20 = sphi %s976_s20, %s1216_s20   ;;  %s924_s19 = sphi %s974_s19, %s1215_s19   ;;  %s920_s18 = sphi %s972_s18, %s1214_s18  }
   0x7   : > { %p42_p0 = scmp.ne.s32.totalorder %s924_s19, %s920_s18  ;;  %p1196_p1 = scmp.eq.s32.totalorder %s993_s22, 0 }
   0x8   : > { %p156_p3 = scmp.eq.s32.totalorder %s587_s23, 1  ;;  %p588_p5 = scmp.ge.s32.totalorder %s932_s21, 1 }
   0x9   : > { %p1002_p4 = por %p1196_p1, %p42_p0  ;;  %p163_p7 = scmp.lt.s32.totalorder %s932_s21, 3 }
   0xa   : > { %p1007_p6 = por %p156_p3, %p42_p0  ;;  %s934_s27 = smov [#allocation5]  }
   0xb   : > { %s1200_s24 = scalar_select %p1002_p4, 1, 0 }
   0xc   : > { %s1201_s25 = scalar_select %p1007_p6, 1, 0 }
   0xd   : > { %p1012_p8 = pnand %p588_p5, %p163_p7  ;;  %s175_s28 = sshll.u32 %s934_s27, 4  ;;  %s176_s28 = int_to_ptr.vmem [resolvable:$true] %s175_s28 }
   0xe   : > { %s935_s30 = smov [#allocation7]   ;;  %s795_s7 = scalar_lea.vmem %s176_s28, 2048 }
   0xf   : > { %s1202_s26 = scalar_select %p1012_p8, 1, 0 }
  0x10   : > { %p721_p9 = pneg %p1012_p8  ;;  %s191_s6 = sshll.u32 %s935_s30, 4  ;;  %s192_s6 = int_to_ptr.vmem [resolvable:$true] %s191_s6 }
  0x11   : > { %p796_p13 = scmp.ne.s32.totalorder %s176_s28, %s795_s7  ;;  %p803_p5 = scmp.lt.s32.totalorder %s176_s28, %s176_s28 }
  0x12   : > { %p1021_p11 = pnand %p721_p9, %p1196_p1  ;;  %p804_p7 = scmp.lt.s32.totalorder %s795_s7, %s795_s7 }
  0x14   : > { %p786_p12 = pneg %p1021_p11  ;;  %p805_p10 = por %p804_p7, %p803_p5 }
  0x16   : > { %p798_p0 = pnand %p796_p13, %p786_p12 }
  0x18   : > { %p799_p3 = pneg %p798_p0 }
  0x1a   : > { %p806_p9 = pnand %p805_p10, %p799_p3 }
  0x1c   : > { %809 = shalt.err (!%p806_p9)
}
  0x1d   : > { %s936_s8 = smov 128   ;;  %s937_s9 = smov 8  }
  0x1e   : > { %724 = dma.hbm_to_vmem [thread:$0]  (!%p1021_p11), %s1191_s1, 2048, %s176_s28, [#allocation6], %s936_s8, %s936_s8, %s937_s9  }
  0x1f   : > { %s821_s12 = scalar_lea.vmem %s192_s6, 2048  ;;  %p829_p2 = scmp.lt.s32.totalorder %s192_s6, %s192_s6 }
  0x20   : > { %p822_p1 = scmp.ne.s32.totalorder %s192_s6, %s821_s12  ;;  %p830_p6 = scmp.lt.s32.totalorder %s821_s12, %s821_s12 }
  0x22   : > { %p824_p13 = pnand %p822_p1, %p786_p12  ;;  %p831_p5 = por %p830_p6, %p829_p2 }
  0x24   : > { %p825_p0 = pneg %p824_p13 }
  0x26   : > { %p832_p10 = pnand %p831_p5, %p825_p0 }
  0x28   : > { %835 = shalt.err (!%p832_p10)
}
  0x29   : > { %727 = dma.hbm_to_vmem [thread:$0]  (!%p1021_p11), %s1193_s3, 2048, %s192_s6, [#allocation6], %s936_s8, %s936_s8, %s937_s9  }
  0x2a   : > { %s1044_s15 = sadd.s32 1, %s932_s21   ;;  %s29_s16 = sadd.s32 1, %s928_s20 }
  0x2b   : > { %s26_s17 = ssub.s32 %s932_s21, %s1044_s15  ;;  %p36_p1 = scmp.ne.s32.totalorder %s928_s20, %s924_s19 }
  0x2c   : > { %p27_p2 = scmp.eq.s32.totalorder %s26_s17, 0  ;;  %p37_p6 = scmp.eq.s32.totalorder %s932_s21, 0 }
  0x2d   : > { %p1204_p12 = scmp.eq.s32.totalorder %s993_s22, 1  ;;  %p738_p7 = scmp.lt.s32.totalorder %s932_s21, 2 }
  0x2e   : > { %s1060_s27 = scalar_select %p27_p2, %s928_s20, %s29_s16  }
  0x2f   : > { %p1054_p3 = por %p1204_p12, %p36_p1  ;;  %p38_p9 = por %p37_p6, %p36_p1 }
  0x30   : > { %s208_s28 = sand.u32 1, %s928_s20   ;;  %s593_s30 = sshll.u32 %s932_s21, 7 }
  0x31   : > { %s1205_s23 = scalar_select %p1054_p3, 1, 0 }
  0x32   : > { %s592_s29 = sshll.u32 %s208_s28, 3  ;;  %s1067_s8 = scalar_lea.hbm %s1190_s0, %s593_s30 }
  0x33   : > { %s212_s9 = scalar_lea.vmem [#allocation2], %s592_s29  ;;  %p1069_p11 = pnand %p738_p7, %p38_p9 }
  0x34   : > { %s219_s10 = sshll.u32 %s212_s9, 4  ;;  %s209_s12 = scalar_lea.sflag [#allocation3], %s208_s28  ;;  %s220_s10 = int_to_ptr.vmem [resolvable:$true] %s219_s10 }
  0x35   : > { %s836_s13 = scalar_lea.hbm %s1067_s8, 128  ;;  %p838_p0 = pneg %p1069_p11 }
  0x36   : > { %p837_p13 = scmp.ne.s32.totalorder %s1067_s8, %s836_s13  ;;  %s841_s17 = scalar_lea.hbm %s1190_s0, 256 }
  0x37   : > { %p842_p1 = scmp.lt.s32.totalorder %s1067_s8, %s1190_s0  ;;  %p843_p2 = scmp.lt.s32.totalorder %s841_s17, %s836_s13 }
  0x38   : > { %p839_p5 = pnand %p838_p0, %p837_p13 }
  0x39   : > { %p844_p6 = por %p843_p2, %p842_p1 }
  0x3a   : > { %p840_p10 = pneg %p839_p5 }
  0x3c   : > { %p845_p12 = pnand %p844_p6, %p840_p10 }
  0x3e   : > { %848 = shalt.err (!%p845_p12)
}
  0x3f   : > { %s849_s6 = scalar_lea.vmem %s220_s10, 128  ;;  %s938_s28 = smov [#allocation2]  }
  0x40   : > { %p850_p7 = scmp.ne.s32.totalorder %s220_s10, %s849_s6  ;;  %s854_s7 = sshll.u32 %s938_s28, 4  ;;  %s855_s7 = int_to_ptr.vmem [resolvable:$false] %s854_s7 }
  0x41   : > { %s856_s9 = scalar_lea.vmem %s855_s7, 256  ;;  %p857_p13 = scmp.lt.s32.totalorder %s220_s10, %s855_s7 }
  0x42   : > { %p852_p9 = pnand %p850_p7, %p838_p0  ;;  %p858_p5 = scmp.lt.s32.totalorder %s856_s9, %s849_s6 }
  0x44   : > { %p853_p3 = pneg %p852_p9  ;;  %p859_p4 = por %p858_p5, %p857_p13 }
  0x46   : > { %p860_p8 = pnand %p859_p4, %p853_p3 }
  0x48   : > { %863 = shalt.err (!%p860_p8)
}
  0x49   : > { %731 = dma.hbm_to_vmem [thread:$0]  (!%p1069_p11), %s1067_s8, 128, %s220_s10, %s209_s12  }
  0x4a   : > { %p1207_p10 = scmp.ne.s32.totalorder %s1202_s26, 0 }
  0x4b   : > { %s1090_s13 = sand.u32 (!%p1207_p10), 1, %s924_s19   ;;  %p1208_p4 = scmp.ne.s32.totalorder (!%p1207_p10), %s1200_s24, 0 }
  0x4c   : > { %228 = sbr.rel (%p1207_p10) target bundleno = 573 (0x23d), region = 40  ;;  %s595_s14 = sshll.u32 (!%p1207_p10), %s1090_s13, 3 }
  0x4d   : > { %s231_s16 = scalar_lea.sflag (!%p1207_p10), [#allocation3], %s1090_s13  ;;  %s1096_s17 = scalar_lea.vmem (!%p1207_p10), [#allocation2], %s595_s14 }
  0x51   : > { %907 = dma.done.wait (%p1208_p4), %s231_s16, 128  }
  0x52   : > { %909 = vsyncadd (%p1208_p4), %s231_s16, 4294967168  ;;  %p1209_p8 = scmp.eq.s32.totalorder %s993_s22, 0 }
  0x54   : > { %911 = dma.done.wait (%p1209_p8), [#allocation6], 4096   ;;  %p1210_p3 = pmov %p1209_p8 }
  0x55   : > { %v939_v0 = vmov 0.0   ;;  %vm940_vm0 = vmmov 0   ;;  %v285_v1 = vld [vmem:[#allocation5 + $0x78] sm:$0xff]  ;;  %v284_v2 = vld [vmem:[#allocation5 + $0x70] sm:$0xff]  ;;  %v283_v3 = vld [vmem:[#allocation5 + $0x68] sm:$0xff]  ;;  %s602_s11 = sshll.u32 %s993_s22, 7 }
  0x56   : > { %913 = vsyncadd (%p1210_p3), [#allocation6], 4294963200  ;;  %639 = vmatprep.subr.mxu0 %v939_v0  ;;  %671 = vmatprep.mubr.msk.f32.mxu0 %vm940_vm0, %v939_v0  ;;  %v282_v4 = vld [vmem:[#allocation5 + $0x60] sm:$0xff]  ;;  %v281_v5 = vld [vmem:[#allocation5 + $0x58] sm:$0xff]  ;;  %s268_s12 = scalar_lea.vmem [#allocation8], %s595_s14  ;;  %s1153_s28 = scalar_lea.hbm %s1195_s5, %s602_s11 }
  0x57   : > { %674 = vmatprep.subr.mxu1 %v939_v0  ;;  %706 = vmatprep.mubr.msk.f32.mxu1 %vm940_vm0, %v939_v0  ;;  %v280_v6 = vld [vmem:[#allocation5 + $0x50] sm:$0xff]  ;;  %v279_v7 = vld [vmem:[#allocation5 + $0x48] sm:$0xff]  ;;  %v278_v8 = vld [vmem:[#allocation5 + $0x40] sm:$0xff]  ;;  %s498_s30 = sshll.u32 %s268_s12, 4  ;;  %s485_s7 = scalar_lea.sflag [#allocation4], %s1090_s13  ;;  %s499_s30 = int_to_ptr.vmem [resolvable:$true] %s498_s30 }
  0x58   : > { %640 = vmatpush3.msra.mxu0 %v285_v1  ;;  %v277_v9 = vld [vmem:[#allocation5 + $0x38] sm:$0xff]  ;;  %v276_v10 = vld [vmem:[#allocation5 + $0x30] sm:$0xff]  ;;  %v275_v11 = vld [vmem:[#allocation5 + $0x28] sm:$0xff]  ;;  %s864_s9 = scalar_lea.vmem %s499_s30, 128  ;;  %p1211_p0 = scmp.ne.s32.totalorder %s1205_s23, 0 }
  0x59   : > { %641 = vmatprep.subr.mxu0 %v939_v0  ;;  %v274_v12 = vld [vmem:[#allocation5 + $0x20] sm:$0xff]  ;;  %v273_v13 = vld [vmem:[#allocation5 + $0x18] sm:$0xff]  ;;  %v272_v14 = vld [vmem:[#allocation5 + $0x10] sm:$0xff]  ;;  %p865_p11 = scmp.ne.s32.totalorder %s499_s30, %s864_s9  ;;  %s941_s22 = smov [#allocation8]  }
  0x5a   : > { %642 = vmatpush3.msra.mxu0 %v284_v2  ;;  %v271_v15 = vld [vmem:[#allocation5 + $0x8] sm:$0xff]  ;;  %v270_v16 = vld [vmem:[#allocation5] sm:$0xff]  ;;  %v269_v17 = vld [vmem:[%s1096_s17] sm:$0xff]  ;;  %s868_s16 = sshll.u32 %s941_s22, 4  ;;  %s869_s16 = int_to_ptr.vmem [resolvable:$false] %s868_s16 }
  0x5b   : > { %643 = vmatprep.subr.mxu0 %v939_v0  ;;  %v405_v18 = vld [vmem:[#allocation7 + $0x78] sm:$0xff]  ;;  %v404_v19 = vld [vmem:[#allocation7 + $0x70] sm:$0xff]  ;;  %v403_v20 = vld [vmem:[#allocation7 + $0x68] sm:$0xff]  ;;  %p866_p1 = pnand %p865_p11, %p1211_p0  ;;  %s870_s14 = scalar_lea.vmem %s869_s16, 256 }
  0x5c   : > { %644 = vmatpush3.msra.mxu0 %v283_v3  ;;  %675 = vmatpush3.msra.mxu1 %v405_v18  ;;  %v402_v21 = vld [vmem:[#allocation7 + $0x60] sm:$0xff]  ;;  %v401_v22 = vld [vmem:[#allocation7 + $0x58] sm:$0xff]  ;;  %v400_v23 = vld [vmem:[#allocation7 + $0x50] sm:$0xff]  ;;  %p871_p6 = scmp.lt.s32.totalorder %s499_s30, %s869_s16  ;;  %p872_p12 = scmp.lt.s32.totalorder %s870_s14, %s864_s9 }
  0x5d   : > { %645 = vmatprep.subr.mxu0 %v939_v0  ;;  %676 = vmatprep.subr.mxu1 %v939_v0  ;;  %v399_v24 = vld [vmem:[#allocation7 + $0x48] sm:$0xff]  ;;  %v398_v25 = vld [vmem:[#allocation7 + $0x40] sm:$0xff]  ;;  %v397_v26 = vld [vmem:[#allocation7 + $0x38] sm:$0xff]  ;;  %p867_p2 = pneg %p866_p1 }
  0x5e   : > { %646 = vmatpush3.msra.mxu0 %v282_v4  ;;  %677 = vmatpush3.msra.mxu1 %v404_v19  ;;  %v396_v27 = vld [vmem:[#allocation7 + $0x30] sm:$0xff]  ;;  %v395_v28 = vld [vmem:[#allocation7 + $0x28] sm:$0xff]  ;;  %v394_v29 = vld [vmem:[#allocation7 + $0x20] sm:$0xff]  ;;  %p873_p7 = por %p872_p12, %p871_p6 }
  0x5f   : > { %647 = vmatprep.subr.mxu0 %v939_v0  ;;  %678 = vmatprep.subr.mxu1 %v939_v0  ;;  %v393_v30 = vld [vmem:[#allocation7 + $0x18] sm:$0xff]  ;;  %v392_v31 = vld [vmem:[#allocation7 + $0x10] sm:$0xff]  ;;  %v391_v32 = vld [vmem:[#allocation7 + $0x8] sm:$0xff] }
  0x60   : > { %648 = vmatpush3.msra.mxu0 %v281_v5  ;;  %679 = vmatpush3.msra.mxu1 %v403_v20  ;;  %v390_v33 = vld [vmem:[#allocation7] sm:$0xff]  ;;  %v599_v34 = vld [vmem:[%s1192_s2] ss:$0 sm:$0xff]  ;;  %p874_p9 = pnand %p873_p7, %p867_p2 }
  0x61   : > { %649 = vmatprep.subr.mxu0 %v939_v0  ;;  %680 = vmatprep.subr.mxu1 %v939_v0  ;;  %v600_v63 = vld [vmem:[%s1194_s4] ss:$0 sm:$0xff] }
  0x62   : > { %650 = vmatpush3.msra.mxu0 %v280_v6  ;;  %681 = vmatpush3.msra.mxu1 %v402_v21 }
  0x63   : > { %651 = vmatprep.subr.mxu0 %v939_v0  ;;  %682 = vmatprep.subr.mxu1 %v939_v0 }
  0x64   : > { %652 = vmatpush3.msra.mxu0 %v279_v7  ;;  %683 = vmatpush3.msra.mxu1 %v401_v22 }
  0x65   : > { %653 = vmatprep.subr.mxu0 %v939_v0  ;;  %684 = vmatprep.subr.mxu1 %v939_v0 }
  0x66   : > { %654 = vmatpush3.msra.mxu0 %v278_v8  ;;  %685 = vmatpush3.msra.mxu1 %v400_v23 }
  0x67   : > { %655 = vmatprep.subr.mxu0 %v939_v0  ;;  %686 = vmatprep.subr.mxu1 %v939_v0 }
  0x68   : > { %656 = vmatpush3.msra.mxu0 %v277_v9  ;;  %687 = vmatpush3.msra.mxu1 %v399_v24 }
  0x69   : > { %657 = vmatprep.subr.mxu0 %v939_v0  ;;  %688 = vmatprep.subr.mxu1 %v939_v0 }
  0x6a   : > { %658 = vmatpush3.msra.mxu0 %v276_v10  ;;  %689 = vmatpush3.msra.mxu1 %v398_v25 }
  0x6b   : > { %659 = vmatprep.subr.mxu0 %v939_v0  ;;  %690 = vmatprep.subr.mxu1 %v939_v0 }
  0x6c   : > { %660 = vmatpush3.msra.mxu0 %v275_v11  ;;  %691 = vmatpush3.msra.mxu1 %v397_v26 }
  0x6d   : > { %661 = vmatprep.subr.mxu0 %v939_v0  ;;  %692 = vmatprep.subr.mxu1 %v939_v0 }
  0x6e   : > { %662 = vmatpush3.msra.mxu0 %v274_v12  ;;  %693 = vmatpush3.msra.mxu1 %v396_v27 }
  0x6f   : > { %663 = vmatprep.subr.mxu0 %v939_v0  ;;  %694 = vmatprep.subr.mxu1 %v939_v0 }
  0x70   : > { %664 = vmatpush3.msra.mxu0 %v273_v13  ;;  %695 = vmatpush3.msra.mxu1 %v395_v28 }
  0x71   : > { %665 = vmatprep.subr.mxu0 %v939_v0  ;;  %696 = vmatprep.subr.mxu1 %v939_v0 }
  0x72   : > { %666 = vmatpush3.msra.mxu0 %v272_v14  ;;  %697 = vmatpush3.msra.mxu1 %v394_v29 }
  0x73   : > { %667 = vmatprep.subr.mxu0 %v939_v0  ;;  %698 = vmatprep.subr.mxu1 %v939_v0 }
  0x74   : > { %668 = vmatpush3.msra.mxu0 %v271_v15  ;;  %699 = vmatpush3.msra.mxu1 %v393_v30 }
  0x75   : > { %669 = vmatprep.subr.mxu0 %v939_v0  ;;  %700 = vmatprep.subr.mxu1 %v939_v0 }
  0x76   : > { %670 = vmatpush3.msra.mxu0 %v270_v16  ;;  %701 = vmatpush3.msra.mxu1 %v392_v31 }
  0x77   : > { %672 = vmatmul.mubr.f32.vlgmr.msra.gmra.mxu0 %v269_v17  ;;  %702 = vmatprep.subr.mxu1 %v939_v0 }
  0x78   : > { %703 = vmatpush3.msra.mxu1 %v391_v32 }
  0x79   : > { %704 = vmatprep.subr.mxu1 %v939_v0 }
  0x7a   : > { %705 = vmatpush3.msra.mxu1 %v390_v33 }
 0x137   : > { %v359_v35 = vpop.f32.mrf.mxu0 }
 0x138   : > { %v360_v36 = vadd.f32 %v599_v34, %v359_v35 }
 0x139   : > { %v673_v37 = vpop.f32.mrf.mxu0 }
 0x13a   : > { %v364_v38 = vmul.f32 0.70710677, %v360_v36  ;;  %v363_v60 = vmul.f32 0.5, %v360_v36 }
 0x13c   : > { %v365_v39 = vand.u32 2147483647, %v364_v38  ;;  %vm385_vm1 = vcmp.lt.f32.partialorder %v364_v38, 0.0 }
 0x13e   : > { %v366_v40 = vmul.f32 0.3275911, %v365_v39  ;;  %v379_v42 = vsub.f32 0.0, %v365_v39 }
 0x140   : > { %v367_v41 = vadd.f32 1.0, %v366_v40  ;;  %v380_v43 = vmul.f32 %v379_v42, %v365_v39 }
 0x142   : > { %780 = vrcp.f32 %v367_v41  ;;  %v381_v45 = vmul.f32 1.442695, %v380_v43 }
 0x144   : > { %782 = vpow2.f32 %v381_v45 }
 0x14f   : > { %v781_v44 = vpop.eup %780 }
 0x150   : > { %v370_v46 = vmul.f32 1.0614054, %v781_v44 }
 0x151   : > { %v783_v55 = vpop.eup %782 }
 0x152   : > { %v371_v47 = vadd.f32 -1.4531521, %v370_v46 }
 0x154   : > { %v372_v48 = vmul.f32 %v781_v44, %v371_v47 }
 0x156   : > { %v373_v49 = vadd.f32 1.4214138, %v372_v48 }
 0x158   : > { %v374_v50 = vmul.f32 %v781_v44, %v373_v49 }
 0x15a   : > { %v375_v51 = vadd.f32 -0.28449672, %v374_v50 }
 0x15c   : > { %v376_v52 = vmul.f32 %v781_v44, %v375_v51 }
 0x15e   : > { %v377_v53 = vadd.f32 0.2548296, %v376_v52 }
 0x160   : > { %v378_v54 = vmul.f32 %v781_v44, %v377_v53 }
 0x162   : > { %v383_v56 = vmul.f32 %v783_v55, %v378_v54 }
 0x164   : > { %v384_v57 = vsub.f32 1.0, %v383_v56 }
 0x166   : > { %v386_v58 = vsub.f32 0.0, %v384_v57 }
 0x168   : > { %v387_v59 = vsel %vm385_vm1, %v386_v58, %v384_v57 }
 0x169   : > { %v388_v61 = vadd.f32 1.0, %v387_v59 }
 0x16b   : > { %v389_v62 = vmul.f32 %v388_v61, %v363_v60 }
 0x16d   : > { %707 = vmatmul.mubr.f32.vlgmr.msra.gmra.mxu1 %v389_v62 }
 0x22d   : > { %v479_v0 = vpop.f32.mrf.mxu1 }
 0x22e   : > { %v480_v1 = vadd.f32 %v600_v63, %v479_v0 }
 0x22f   : > { %v708_v2 = vpop.f32.mrf.mxu1 }
 0x230   : > { %483 = vst [vmem:[%s268_s12] sm:$0xff] %v480_v1 }
 0x231   : > { %877 = shalt.err (!%p874_p9)
}
 0x232   : > { %s878_s17 = scalar_lea.hbm %s1153_s28, 128  ;;  %s882_s26 = scalar_lea.hbm %s1195_s5, 256 }
 0x233   : > { %p879_p13 = scmp.ne.s32.totalorder %s1153_s28, %s878_s17  ;;  %p883_p4 = scmp.lt.s32.totalorder %s1153_s28, %s1195_s5 }
 0x234   : > { %p884_p8 = scmp.lt.s32.totalorder %s882_s26, %s878_s17 }
 0x235   : > { %p880_p5 = pnand %p879_p13, %p1211_p0 }
 0x236   : > { %p885_p3 = por %p884_p8, %p883_p4 }
 0x237   : > { %p881_p10 = pneg %p880_p5 }
 0x239   : > { %p886_p11 = pnand %p885_p3, %p881_p10 }
 0x23b   : > { %889 = shalt.err (!%p886_p11)
}
 0x23c   : > { %719 = dma.vmem_to_hbm [thread:$0]  (%p1211_p0), %s499_s30, 128, %s1153_s28, %s485_s7  }
 0x23d PF: > { %s510_s11 = sand.u32 1, %s920_s18   ;;  %p1212_p1 = scmp.ne.s32.totalorder %s1201_s25, 0 }
 0x23e   : > { %p1213_p2 = scmp.ge.s32.totalorder %s932_s21, 2  ;;  %s511_s12 = scalar_lea.sflag [#allocation4], %s510_s11 }
 0x240   : > { %p733_p6 = pnand %p1213_p2, %p1212_p1 }
 0x242   : > { %p734_p12 = pneg %p733_p6 }
 0x244   : > { %915 = dma.done.wait (%p734_p12), %s511_s12, 128  }
 0x245   : > { %917 = vsyncadd (%p734_p12), %s511_s12, 4294967168  ;;  %p19_p7 = scmp.ge.s32.totalorder %s1044_s15, 4   ;;  %s1214_s18 = smov %s924_s19 }
 0x246   : > { %s1215_s19 = smov %s928_s20  ;;  %s1216_s20 = smov %s1060_s27 }
 0x247   : > { %s1217_s21 = smov %s1044_s15  ;;  %21 = sbr.rel (!%p19_p7) target bundleno = 6 (0x6), region = 93 }
 0x24c   :  { %516 = vsyncpa [#allocation3], 1 }
 0x24d   :  { %518 = vsyncpa [#allocation3 + $0x1], 1 }
 0x24e   :  { %519 = vsyncpa [#allocation6], 1 }
 0x24f   :  { %520 = vsyncpa [#allocation4], 1 }
 0x250   :  { %522 = vsyncpa [#allocation4 + $0x1], 1 }

</bundles_post_ra>
